<compile_context>
chip_gen: v7x
topology: tpu7x:2x2x1
jax: 0.10.0
libtpu: 0.0.40
codegen_flags: <defaults>
</compile_context>

<pallas_src>
import functools

import jax
import jax.numpy as jnp
from jax import lax
from jax.experimental import pallas as pl
from jax.experimental.pallas import tpu as pltpu


_NEG_INIT = -1.0e30  # finite "minus infinity": keeps exp(m_prev - m_new) NaN-free


def _round_up(a: int, b: int) -> int:
    return ((a + b - 1) // b) * b


def _tpu_generation() -> int:
    """Best-effort TPU generation detection (5, 6, 7) -- 0 when unknown."""
    try:
        kind = jax.devices()[0].device_kind.lower()
    except Exception:  # pragma: no cover - never fatal
        return 0
    if "v5" in kind:
        return 5
    if "v6" in kind:
        return 6
    if "v7" in kind or "7x" in kind:
        return 7
    return 0


def _tpu_config(seq_len: int):
    """Generation-aware (q_tile, kv_tile, vmem_limit) selection."""
    gen = _tpu_generation()
    if gen in (5, 6):
        # 128 MiB physical VMEM -> big tiles, fewer online-softmax rescale passes.
        tq_cap, tkv_cap = 512, 1024
        vmem_limit = 96 * 1024 * 1024
    else:
        # v7x (64 MiB VMEM) or unknown: conservative sizing.
        tq_cap, tkv_cap = 256, 512
        vmem_limit = 32 * 1024 * 1024

    s_r8 = _round_up(seq_len, 8)
    if s_r8 <= tq_cap:
        tq = tkv = s_r8  # full-array blocks: (8,128) rule satisfied, no padding loop
        # v7x: the Q axis shards across the 2 TensorCores -> expose >= 2 Q tiles.
        if gen == 7 and s_r8 >= 256 and s_r8 % 16 == 0:
            tq = s_r8 // 2
    else:
        tq = tq_cap
        tkv = tkv_cap if s_r8 >= tkv_cap else tq_cap  # tkv is a multiple of tq
    return gen, tq, tkv, vmem_limit


def _qkv_proj_kernel(x_ref, w_ref, q_ref, k_ref, v_ref):
    """One row tile: [tr, d_in] @ [d_in, 3*d_pad] -> Q|K|V slabs (lane-dense).

    The 1/sqrt(d_k) scale is pre-folded into the W_q columns on the host.
    Slices land on 128-lane boundaries -> no relayout.
    """
    p = jnp.dot(x_ref[...], w_ref[...], preferred_element_type=jnp.float32)
    d = q_ref.shape[-1]
    q_ref[...] = p[:, :d].astype(q_ref.dtype)
    k_ref[...] = p[:, d:2 * d].astype(k_ref.dtype)
    v_ref[...] = p[:, 2 * d:].astype(v_ref.dtype)


def _flash_attn_kernel(q_ref, k_ref, v_ref, o_ref, m_s, l_s, acc_s,
                       *, seq_len, tkv, mask_kv, exp_dtype, approx_recip):
    """One (q_tile, kv_tile) grid step of online-softmax attention.

    q_ref : [TQ,  d_pad] pre-projected, pre-scaled queries (compute dtype)
    k_ref : [TKV, d_pad] pre-projected keys
    v_ref : [TKV, d_pad] pre-projected values
    o_ref : [TQ,  d_pad] context vectors (padded width, lane-dense store)
    scratch: m_s/l_s [TQ,1] f32 running max / denominator, acc_s [TQ,d_pad] f32
    """
    kv = pl.program_id(1)

    @pl.when(kv == 0)
    def _init():
        m_s[...] = jnp.full_like(m_s, _NEG_INIT)
        l_s[...] = jnp.zeros_like(l_s)
        acc_s[...] = jnp.zeros_like(acc_s)

    q = q_ref[...]
    k = k_ref[...]
    v = v_ref[...]

    # Scores: contract over the shared feature axis directly (no keys.T / XLU
    # work); MXU operands already in the compute dtype, f32 accumulation.
    s = lax.dot_general(q, k, (((1,), (1,)), ((), ())),
                        preferred_element_type=jnp.float32)

    # Online (flash) softmax update; statistics kept in f32.
    m_prev = m_s[...]
    m_new = jnp.maximum(m_prev, jnp.max(s, axis=-1, keepdims=True))
    alpha = jnp.exp(m_prev - m_new)                       # [TQ,1], finite (no -inf)
    # bf16 exp on v6e/v7x (2x EUP throughput); f32 elsewhere.
    p = jnp.exp((s - m_new).astype(exp_dtype))

    if mask_kv:
        # Padded x rows are zero -> padded key rows are zero -> their scores are
        # exactly 0 (finite). Zero their probabilities AFTER the exp: exact and
        # NaN-free (running max may see 0, which only loosens the offset).
        pos = kv * tkv + lax.broadcasted_iota(jnp.int32, p.shape, 1)
        p = jnp.where(pos < seq_len, p, 0.0)

    l_s[...] = alpha * l_s[...] + jnp.sum(p.astype(jnp.float32), axis=-1,
                                          keepdims=True)
    acc_s[...] = alpha * acc_s[...] + jnp.dot(p.astype(v.dtype), v,
                                              preferred_element_type=jnp.float32)
    m_s[...] = m_new

    @pl.when(kv == pl.num_programs(1) - 1)
    def _finalize():
        inv_l = pl.reciprocal(l_s[...], approx=approx_recip)
        o_ref[...] = (acc_s[...] * inv_l).astype(o_ref.dtype)


def self_attention_v1(x, w_query, w_key, w_value, *, use_bf16_compute=None):
    """x: [S, d_in]; w_*: [d_in, d_out] -> context vectors [S, d_out]."""
    S, d_in = x.shape
    d_out = w_query.shape[1]
    scale = 1.0 / (d_out ** 0.5)          # d_k of the unpadded module (PyTorch match)

    gen, tq, tkv, vmem_limit = _tpu_config(S)
    s_pad = _round_up(_round_up(S, 8), tkv)
    mask_kv = s_pad != S
    d_pad = _round_up(d_out, 128)         # lane-dense projection / output width

    if use_bf16_compute is None:
        use_bf16_compute = (x.dtype == jnp.bfloat16)
    compute_dtype = jnp.bfloat16 if use_bf16_compute else jnp.float32
    # v5e's EUP has no bf16 path -> keep the exp in f32 there.
    exp_dtype = (jnp.bfloat16
                 if (compute_dtype == jnp.bfloat16 and gen != 5) else jnp.float32)
    out_dtype = x.dtype
    cdt_size = jnp.dtype(compute_dtype).itemsize

    # ---- host-side packing (cheap, O(S*d_in + d_in*d_out)) --------------------
    x_p = x if s_pad == S else jnp.pad(x, ((0, s_pad - S), (0, 0)))
    pad_cols = ((0, 0), (0, d_pad - d_out))
    # Scale folded into W_q -> no per-score multiply in the kernels. Padded
    # columns are zero, so they contribute 0 everywhere (exact).
    w_qkv = jnp.concatenate([
        jnp.pad(w_query.astype(jnp.float32) * scale, pad_cols),
        jnp.pad(w_key.astype(jnp.float32), pad_cols),
        jnp.pad(w_value.astype(jnp.float32), pad_cols),
    ], axis=1).astype(x.dtype)            # [d_in, 3*d_pad]

    # ---- pass 1: fused QKV projection (each row tile projected once) ----------
    n_rows = s_pad // tq
    proj_cost = pl.CostEstimate(
        flops=int(2 * s_pad * d_in * 3 * d_pad),
        transcendentals=0,
        bytes_accessed=int(x_p.size * x_p.dtype.itemsize
                           + w_qkv.size * w_qkv.dtype.itemsize
                           + 3 * s_pad * d_pad * cdt_size),
    )
    # Note: the weight block has a constant index_map; for very large d_in it
    # could be single-buffered (pipeline_mode), but it is tiny here.
    q_proj, k_proj, v_proj = pl.pallas_call(
        _qkv_proj_kernel,
        out_shape=tuple(jax.ShapeDtypeStruct((s_pad, d_pad), compute_dtype)
                        for _ in range(3)),
        grid_spec=pltpu.PrefetchScalarGridSpec(
            num_scalar_prefetch=0,
            grid=(n_rows,),
            in_specs=[
                pl.BlockSpec((tq, d_in), lambda i: (i, 0)),
                pl.BlockSpec((d_in, 3 * d_pad), lambda i: (0, 0)),
            ],
            out_specs=tuple(pl.BlockSpec((tq, d_pad), lambda i: (i, 0))
                            for _ in range(3)),
        ),
        compiler_params=pltpu.CompilerParams(
            dimension_semantics=("parallel",),
            vmem_limit_bytes=vmem_limit,
        ),
        cost_estimate=proj_cost,
    )(x_p, w_qkv)

    # ---- pass 2: flash attention over the projected tiles ---------------------
    kernel = functools.partial(
        _flash_attn_kernel,
        seq_len=S, tkv=tkv, mask_kv=mask_kv,
        exp_dtype=exp_dtype,
        approx_recip=(compute_dtype == jnp.bfloat16),
    )
    n_q, n_kv = s_pad // tq, s_pad // tkv
    attn_cost = pl.CostEstimate(
        flops=int(2 * 2 * s_pad * s_pad * d_pad),
        transcendentals=int(s_pad * s_pad),
        # K and V tiles are re-read once per Q tile (honest HBM traffic).
        bytes_accessed=int((1 + 2 * n_q) * s_pad * d_pad * cdt_size
                           + s_pad * d_pad * jnp.dtype(out_dtype).itemsize),
    )
    out_padded = pl.pallas_call(
        kernel,
        out_shape=jax.ShapeDtypeStruct((s_pad, d_pad), out_dtype),
        grid_spec=pltpu.PrefetchScalarGridSpec(
            num_scalar_prefetch=0,
            grid=(n_q, n_kv),
            in_specs=[
                pl.BlockSpec((tq, d_pad), lambda qi, ki: (qi, 0)),   # Q tile
                pl.BlockSpec((tkv, d_pad), lambda qi, ki: (ki, 0)),  # K tile
                pl.BlockSpec((tkv, d_pad), lambda qi, ki: (ki, 0)),  # V tile
            ],
            out_specs=pl.BlockSpec((tq, d_pad), lambda qi, ki: (qi, 0)),
            scratch_shapes=[
                pltpu.VMEM((tq, 1), jnp.float32),       # running max
                pltpu.VMEM((tq, 1), jnp.float32),       # running denominator
                pltpu.VMEM((tq, d_pad), jnp.float32),   # output accumulator
            ],
        ),
        compiler_params=pltpu.CompilerParams(
            dimension_semantics=("parallel", "arbitrary"),  # Q axis -> 2 TCs on v7x
            vmem_limit_bytes=vmem_limit,
        ),
        cost_estimate=attn_cost,
    )(q_proj, k_proj, v_proj)

    return out_padded[:S, :d_out]


def self_attention_v1_ref(x, w_query, w_key, w_value):
    """Pure-JAX reference mirroring the PyTorch forward (full f32 precision)."""
    hp = jax.lax.Precision.HIGHEST
    keys = jnp.dot(x, w_key, precision=hp)
    queries = jnp.dot(x, w_query, precision=hp)
    values = jnp.dot(x, w_value, precision=hp)
    attn_scores = jnp.dot(queries, keys.T, precision=hp)
    attn_weights = jax.nn.softmax(attn_scores / keys.shape[-1] ** 0.5, axis=-1)
    return jnp.dot(attn_weights, values, precision=hp)


if __name__ == "__main__":
    # Small shapes consistent with the module's forward: x is [seq, d_in].
    seq, d_in, d_out = 8, 32, 16

    key = jax.random.PRNGKey(0)
    kx, kq, kk, kv_, kx2 = jax.random.split(key, 5)

    x = jax.random.normal(kx, (seq, d_in), dtype=jnp.float32)
    # torch.rand -> uniform [0, 1); replicate deterministically.
    w_query = jax.random.uniform(kq, (d_in, d_out), dtype=jnp.float32)
    w_key = jax.random.uniform(kk, (d_in, d_out), dtype=jnp.float32)
    w_value = jax.random.uniform(kv_, (d_in, d_out), dtype=jnp.float32)

    out = jax.block_until_ready(self_attention_v1(x, w_query, w_key, w_value))
    ref = self_attention_v1_ref(x, w_query, w_key, w_value)
    assert out.shape == (seq, d_out)
    assert jnp.allclose(out, ref, atol=2e-3, rtol=2e-3), "mismatch vs reference"

    # Second check: sequence length that requires padding + in-kernel KV masking.
    seq2 = 12
    x2 = jax.random.normal(kx2, (seq2, d_in), dtype=jnp.float32)
    out2 = jax.block_until_ready(self_attention_v1(x2, w_query, w_key, w_value))
    ref2 = self_attention_v1_ref(x2, w_query, w_key, w_value)
    assert out2.shape == (seq2, d_out)
    assert jnp.allclose(out2, ref2, atol=2e-3, rtol=2e-3), "mismatch (padded path)"

    print("KERNEL_OK")
</pallas_src>

<mosaic_0001>
module attributes {stable_mosaic.version = 11 : i64} {
  func.func @_qkv_proj_kernel(%arg0: i32, %arg1: memref<8x32xf32, #tpu.memory_space<vmem>>, %arg2: memref<32x384xf32, #tpu.memory_space<vmem>>, %arg3: memref<8x128xf32, #tpu.memory_space<vmem>>, %arg4: memref<8x128xf32, #tpu.memory_space<vmem>>, %arg5: memref<8x128xf32, #tpu.memory_space<vmem>>) attributes {dimension_semantics = [#tpu.dimension_semantics<parallel>], iteration_bounds = array<i64: 1>, scalar_prefetch = 0 : i64, scratch_operands = 0 : i64, tpu.core_type = #tpu.core_type<tc>, window_params = [{transform_indices = @transform_0, window_bounds = array<i64: 8, 32>}, {pipeline_mode = #tpu.pipeline_mode<synchronous>, transform_indices = @transform_1, window_bounds = array<i64: 32, 384>}, {transform_indices = @transform_2, window_bounds = array<i64: 8, 128>}, {transform_indices = @transform_3, window_bounds = array<i64: 8, 128>}, {transform_indices = @transform_4, window_bounds = array<i64: 8, 128>}]} {
    %c0 = arith.constant 0 : index
    %c0_0 = arith.constant 0 : index
    %0 = vector.load %arg1[%c0, %c0_0] : memref<8x32xf32, #tpu.memory_space<vmem>>, vector<8x32xf32>
    %c0_1 = arith.constant 0 : index
    %c0_2 = arith.constant 0 : index
    %1 = vector.load %arg2[%c0_1, %c0_2] : memref<32x384xf32, #tpu.memory_space<vmem>>, vector<32x384xf32>
    %cst = arith.constant dense<0.000000e+00> : vector<8x384xf32>
    %2 = tpu.matmul %0, %1, %cst {dimension_numbers = #tpu.dot_dimension_numbers<[1], [0], [0], [1], [0, 0, 1, 1], [], []>} : vector<8x32xf32>, vector<32x384xf32>, vector<8x384xf32> -> vector<8x384xf32>
    %3 = vector.extract_strided_slice %2 {offsets = [0, 0], sizes = [8, 128], strides = [1, 1]} : vector<8x384xf32> to vector<8x128xf32>
    %c0_3 = arith.constant 0 : index
    %c0_4 = arith.constant 0 : index
    %4 = vector.load %arg3[%c0_3, %c0_4] : memref<8x128xf32, #tpu.memory_space<vmem>>, vector<8x128xf32>
    tpu.vector_store %arg3[%c0_3, %c0_4], %3 {strides = array<i32>} : memref<8x128xf32, #tpu.memory_space<vmem>>, vector<8x128xf32>,
    %5 = vector.extract_strided_slice %2 {offsets = [0, 128], sizes = [8, 128], strides = [1, 1]} : vector<8x384xf32> to vector<8x128xf32>
    %c0_5 = arith.constant 0 : index
    %c0_6 = arith.constant 0 : index
    %6 = vector.load %arg4[%c0_5, %c0_6] : memref<8x128xf32, #tpu.memory_space<vmem>>, vector<8x128xf32>
    tpu.vector_store %arg4[%c0_5, %c0_6], %5 {strides = array<i32>} : memref<8x128xf32, #tpu.memory_space<vmem>>, vector<8x128xf32>,
    %7 = vector.extract_strided_slice %2 {offsets = [0, 256], sizes = [8, 128], strides = [1, 1]} : vector<8x384xf32> to vector<8x128xf32>
    %c0_7 = arith.constant 0 : index
    %c0_8 = arith.constant 0 : index
    %8 = vector.load %arg5[%c0_7, %c0_8] : memref<8x128xf32, #tpu.memory_space<vmem>>, vector<8x128xf32>
    tpu.vector_store %arg5[%c0_7, %c0_8], %7 {strides = array<i32>} : memref<8x128xf32, #tpu.memory_space<vmem>>, vector<8x128xf32>,
    return
  }
  func.func @transform_0(%arg0: i32) -> (i32, i32) {
    %c0_i32 = arith.constant 0 : i32
    %c0_i32_0 = arith.constant 0 : i32
    return %arg0, %c0_i32 : i32, i32
  }
  func.func @transform_1(%arg0: i32) -> (i32, i32) {
    %c0_i32 = arith.constant 0 : i32
    %c0_i32_0 = arith.constant 0 : i32
    %c0_i32_1 = arith.constant 0 : i32
    return %c0_i32, %c0_i32_0 : i32, i32
  }
  func.func @transform_2(%arg0: i32) -> (i32, i32) {
    %c0_i32 = arith.constant 0 : i32
    %c0_i32_0 = arith.constant 0 : i32
    return %arg0, %c0_i32 : i32, i32
  }
  func.func @transform_3(%arg0: i32) -> (i32, i32) {
    %c0_i32 = arith.constant 0 : i32
    %c0_i32_0 = arith.constant 0 : i32
    return %arg0, %c0_i32 : i32, i32
  }
  func.func @transform_4(%arg0: i32) -> (i32, i32) {
    %c0_i32 = arith.constant 0 : i32
    %c0_i32_0 = arith.constant 0 : i32
    return %arg0, %c0_i32 : i32, i32
  }
}

</mosaic_0001>

<bundles_post_ra>
// kernel: tpu_custom_call.1
= control target key start
LH: loop header
LB: loop body
LE: loop exit
PB: predicated region body
PF: predicated region fallthrough
CT: control target
= control target key end

     0   :  { %10 = vsyncpa [#allocation3], 0  ;;  %s522_s0 = inlined_call_operand.hbm [shape: f32[8,32], index: 0, kind: input, shape index: {}]   ;;  %s523_s1 = inlined_call_operand.hbm [shape: f32[32,384], index: 1, kind: input, shape index: {}]   ;;  %s524_s2 = inlined_call_operand.hbm [shape: f32[8,128], index: 2, kind: output, shape index: {0}]   ;;  %s525_s3 = inlined_call_operand.hbm [shape: f32[8,128], index: 3, kind: output, shape index: {1}]   ;;  %s526_s4 = inlined_call_operand.hbm [shape: f32[8,128], index: 4, kind: output, shape index: {2}]  }
   0x1   :  { %11 = vsyncpa [#allocation6], 0 }
   0x2   :  { %12 = vsyncpa [#allocation4], 0 }
   0x3   :  { %13 = vsyncpa [#allocation9], 0  ;;  %s406_s15 = smov [#allocation2]   ;;  %s407_s17 = smov [#allocation5]  }
   0x4   :  { %s20_s16 = sshll.u32 %s406_s15, 4  ;;  %s29_s18 = sshll.u32 %s407_s17, 4  ;;  %s21_s16 = int_to_ptr.vmem [resolvable:$true] %s20_s16  ;;  %s441_s18 = int_to_ptr.vmem [resolvable:$true] %s29_s18 }
   0x5   :  { %s288_s21 = scalar_lea.hbm %s522_s0, 128 }
   0x6   :  { %p289_p0 = scmp.ne.s32.totalorder %s522_s0, %s288_s21  ;;  %p292_p1 = scmp.lt.u32.totalorder %s288_s21, %s522_s0 }
   0x8   :  { %p294_p2 = pnand %p292_p1, %p289_p0 }
   0xa   :  { %297 = shalt.err (!%p294_p2)
}
   0xb   :  { %s298_s26 = scalar_lea.vmem %s21_s16, 128  ;;  %p303_p4 = scmp.lt.s32.totalorder %s21_s16, %s21_s16 }
   0xc   :  { %p299_p3 = scmp.ne.s32.totalorder %s21_s16, %s298_s26  ;;  %p304_p5 = scmp.lt.s32.totalorder %s298_s26, %s298_s26 }
   0xe   :  { %p305_p6 = por %p304_p5, %p303_p4 }
  0x10   :  { %p306_p7 = pnand %p305_p6, %p299_p3 }
  0x12   :  { %309 = shalt.err (!%p306_p7)
}
  0x13   :  { %23 = dma.hbm_to_vmem [thread:$0]  %s522_s0, 128, %s21_s16, [#allocation3]  }
  0x14   :  { %s310_s5 = scalar_lea.hbm %s523_s1, 1536 }
  0x15   :  { %p311_p8 = scmp.ne.s32.totalorder %s523_s1, %s310_s5  ;;  %p314_p9 = scmp.lt.u32.totalorder %s310_s5, %s523_s1 }
  0x17   :  { %p316_p10 = pnand %p314_p9, %p311_p8 }
  0x19   :  { %319 = shalt.err (!%p316_p10)
}
  0x1a   :  { %s320_s10 = scalar_lea.vmem %s441_s18, 1536  ;;  %p325_p12 = scmp.lt.s32.totalorder %s441_s18, %s441_s18 }
  0x1b   :  { %p321_p11 = scmp.ne.s32.totalorder %s441_s18, %s320_s10  ;;  %p326_p13 = scmp.lt.s32.totalorder %s320_s10, %s320_s10 }
  0x1d   :  { %p327_p0 = por %p326_p13, %p325_p12 }
  0x1f   :  { %p328_p1 = pnand %p327_p0, %p321_p11 }
  0x21   :  { %331 = shalt.err (!%p328_p1)
}
  0x22   :  { %s408_s0 = smov 384   ;;  %s409_s11 = smov 24  }
  0x23   :  { %35 = dma.hbm_to_vmem [thread:$0]  %s523_s1, 1536, %s441_s18, [#allocation6], %s408_s0, %s408_s0, %s409_s11  }
  0x24   :  { %398 = dma.done.wait [#allocation3], 128  }
  0x25   :  { %399 = vsyncadd [#allocation3], 4294967168 }
  0x26   :  { %400 = dma.done.wait [#allocation6], 1536  }
  0x27   :  { %401 = vsyncadd [#allocation6], 4294965760  ;;  %v410_v0 = vmov 0.0|0.0   ;;  %v411_v1 = vmov 0.0   ;;  %vm412_vm0 = vmmov 0   ;;  %v44_v2 = vld [vmem:[#allocation5 + $0x8] sm:$0xff] }
  0x28   :  { %272 = vmatprep.subr.bf16.mxu1 %v410_v0  ;;  %123 = vmatprep.mubr.f32.mxu0 %v411_v1  ;;  %v47_v3 = vld [vmem:[#allocation5 + $0x20] sm:$0xff]  ;;  %v46_v6 = vld [vmem:[#allocation5 + $0x18] sm:$0xff]  ;;  %v45_v7 = vld [vmem:[#allocation5 + $0x10] sm:$0xff]  ;;  %vm55_vm1 = vcmask 261120   ;;  %s413_s1 = smov [#allocation7]   ;;  %s414_s15 = smov [#allocation8]  }
  0x29   :  { %261 = vmatprep.mubr.msk.f32.mxu1 %vm412_vm0, %v411_v1  ;;  %v43_v4 = vld [vmem:[#allocation5] sm:$0xff]  ;;  %v264_v5 = vpack.c.bf16 %v47_v3, %v44_v2  ;;  %v48_v8 = vld [vmem:[#allocation5 + $0x28] sm:$0xff]  ;;  %v50_v11 = vld [vmem:[#allocation5 + $0x38] sm:$0xff]  ;;  %s209_s14 = sshll.u32 %s413_s1, 4  ;;  %s219_s16 = sshll.u32 %s414_s15, 4  ;;  %s210_s14 = int_to_ptr.vmem [resolvable:$true] %s209_s14  ;;  %s472_s16 = int_to_ptr.vmem [resolvable:$true] %s219_s16 }
  0x2a   :  { %v266_v9 = vpack.c.bf16 %v46_v6, %v43_v4  ;;  %v273_v10 = vpack.c.bf16 %v48_v8, %v45_v7  ;;  %v53_v12 = vld [vmem:[#allocation5 + $0x50] sm:$0xff]  ;;  %v52_v15 = vld [vmem:[#allocation5 + $0x48] sm:$0xff]  ;;  %v51_v16 = vld [vmem:[#allocation5 + $0x40] sm:$0xff]  ;;  %s415_s17 = smov [#allocation10]   ;;  %s332_s19 = scalar_lea.vmem %s210_s14, 128 }
  0x2b   :  { %v49_v13 = vld [vmem:[#allocation5 + $0x30] sm:$0xff]  ;;  %265 = vmatprep.subr.bf16.mxu0 %v264_v5  ;;  %v268_v14 = vpack.c.bf16 %v53_v12, %v50_v11  ;;  %v54_v17 = vld [vmem:[#allocation5 + $0x58] sm:$0xff]  ;;  %s229_s18 = sshll.u32 %s415_s17, 4  ;;  %p333_p2 = scmp.ne.s32.totalorder %s210_s14, %s332_s19  ;;  %s474_s18 = int_to_ptr.vmem [resolvable:$true] %s229_s18 }
  0x2c   :  { %267 = vmatpush1.bf16.msra.mxu0 %v266_v9  ;;  %274 = vmatpush3.bf16.msra.mxu1 %v273_v10  ;;  %v270_v18 = vpack.c.bf16 %v52_v15, %v49_v13  ;;  %v276_v19 = vpack.c.bf16 %v54_v17, %v51_v16  ;;  %v42_v20 = vld [vmem:[#allocation2] sm:$0xff]  ;;  %p337_p3 = scmp.lt.s32.totalorder %s210_s14, %s210_s14  ;;  %p338_p4 = scmp.lt.s32.totalorder %s332_s19, %s332_s19 }
  0x2d   :  { %269 = vmatprep.subr.bf16.mxu0 %v268_v14  ;;  %275 = vmatprep.subr.bf16.mxu1 %v410_v0 }
  0x2e   :  { %p339_p5 = por %p338_p4, %p337_p3 }
  0x30   :  { %271 = vmatpush1.bf16.msra.mxu0 %v270_v18  ;;  %277 = vmatpush3.bf16.msra.mxu1 %v276_v19  ;;  %p340_p6 = pnand %p339_p5, %p333_p2 }
  0x33   :  { %246 = vmatmul.mubr.msk.f32.vlgmr.msra.gmra.mrb[0].mxu0 %vm55_vm1, %v42_v20  ;;  %262 = vmatmul.mubr.msk.f32.vlgmr.msra.gmra.mrb[0].mxu1 %vm55_vm1, %v42_v20 }
 0x106   :  { %v125_v21 = vpop.f32.mrb[0].mxu0  ;;  %v196_v22 = vpop.f32.mrb[0].mxu1 }
 0x107   :  { %200 = vst [vmem:[#allocation7] sm:$0xff] %v125_v21  ;;  %v127_v23 = vpop.f32.mrb[1].mxu0  ;;  %202 = vst [vmem:[#allocation10] sm:$0xff] %v196_v22  ;;  %v263_v24 = vpop.f32.mrb[1].mxu1 }
 0x108   :  { %201 = vst [vmem:[#allocation8] sm:$0xff] %v127_v23 }
 0x109   :  { %343 = shalt.err (!%p340_p6)
}
 0x10a   :  { %s344_s22 = scalar_lea.hbm %s524_s2, 128 }
 0x10b   :  { %p345_p7 = scmp.ne.s32.totalorder %s524_s2, %s344_s22  ;;  %p348_p8 = scmp.lt.u32.totalorder %s344_s22, %s524_s2 }
 0x10d   :  { %p350_p9 = pnand %p348_p8, %p345_p7 }
 0x10f   :  { %353 = shalt.err (!%p350_p9)
}
 0x110   :  { %212 = dma.vmem_to_hbm [thread:$0]  %s210_s14, 128, %s524_s2, [#allocation4]  }
 0x111   :  { %s354_s29 = scalar_lea.vmem %s472_s16, 128  ;;  %p359_p11 = scmp.lt.s32.totalorder %s472_s16, %s472_s16 }
 0x112   :  { %p355_p10 = scmp.ne.s32.totalorder %s472_s16, %s354_s29  ;;  %p360_p12 = scmp.lt.s32.totalorder %s354_s29, %s354_s29 }
 0x114   :  { %p361_p13 = por %p360_p12, %p359_p11 }
 0x116   :  { %p362_p0 = pnand %p361_p13, %p355_p10 }
 0x118   :  { %365 = shalt.err (!%p362_p0)
}
 0x119   :  { %s366_s6 = scalar_lea.hbm %s525_s3, 128 }
 0x11a   :  { %p367_p1 = scmp.ne.s32.totalorder %s525_s3, %s366_s6  ;;  %p370_p2 = scmp.lt.u32.totalorder %s366_s6, %s525_s3 }
 0x11c   :  { %p372_p3 = pnand %p370_p2, %p367_p1 }
 0x11e   :  { %375 = shalt.err (!%p372_p3)
}
 0x11f   :  { %222 = dma.vmem_to_hbm [thread:$0]  %s472_s16, 128, %s525_s3, [#allocation9]  }
 0x120   :  { %s376_s11 = scalar_lea.vmem %s474_s18, 128  ;;  %p381_p5 = scmp.lt.s32.totalorder %s474_s18, %s474_s18 }
 0x121   :  { %p377_p4 = scmp.ne.s32.totalorder %s474_s18, %s376_s11  ;;  %p382_p6 = scmp.lt.s32.totalorder %s376_s11, %s376_s11 }
 0x123   :  { %p383_p7 = por %p382_p6, %p381_p5 }
 0x125   :  { %p384_p8 = pnand %p383_p7, %p377_p4 }
 0x127   :  { %387 = shalt.err (!%p384_p8)
}
 0x128   :  { %s388_s1 = scalar_lea.hbm %s526_s4, 128 }
 0x129   :  { %p389_p9 = scmp.ne.s32.totalorder %s526_s4, %s388_s1  ;;  %p392_p10 = scmp.lt.u32.totalorder %s388_s1, %s526_s4 }
 0x12b   :  { %p394_p11 = pnand %p392_p10, %p389_p9 }
 0x12d   :  { %397 = shalt.err (!%p394_p11)
}
 0x12e   :  { %232 = dma.vmem_to_hbm [thread:$0]  %s474_s18, 128, %s526_s4, [#allocation9]  }
 0x12f   :  { %402 = dma.done.wait [#allocation4], 128  }
 0x130   :  { %403 = vsyncadd [#allocation4], 4294967168 }
 0x131   :  { %404 = dma.done.wait [#allocation9], 256  }
 0x132   :  { %405 = vsyncadd [#allocation9], 4294967040 }
 0x133   :  { %242 = vsyncpa [#allocation3], 1 }
 0x134   :  { %243 = vsyncpa [#allocation6], 1 }
 0x135   :  { %244 = vsyncpa [#allocation4], 1 }
 0x136   :  { %245 = vsyncpa [#allocation9], 1 }

</bundles_post_ra>
